<compile_context>
chip_gen: v7x
topology: tpu7x:2x2x1
jax: 0.10.0
libtpu: 0.0.40
codegen_flags: <defaults>
</compile_context>

<pallas_src>
import functools

import numpy as np
import jax
import jax.numpy as jnp
from jax import lax
from jax.experimental import pallas as pl
from jax.experimental.pallas import tpu as pltpu

CENTER_R = 3      # odd -> `create_labels` path of the PyTorch module
SIGMA = 5.5
NEG_CONST = 80.0  # hard-coded `80` in the PyTorch code (neg_weight is unused)
WEIGHT_SUM = 1.0 + NEG_CONST          # sum(weight) for un-clipped R x R windows
_TILE_BUDGET_BYTES = 12 * 1024 * 1024  # per-buffer logits tile (x2 double-buffered)


def _round_up(x, m):
    return (x + m - 1) // m * m


def _maybe_check_unclipped(cx, cy, H, W, half):
    """Best-effort guard: the PyTorch module (and the constant-folded weight
    sum / negative count) require the R x R window to stay inside the image.
    Silently skipped when the centers are traced (inside jit)."""
    try:
        cxn = np.asarray(jax.device_get(cx))
        cyn = np.asarray(jax.device_get(cy))
    except Exception:
        return
    ok = ((cxn >= half) & (cxn <= H - 1 - half) &
          (cyn >= half) & (cyn <= W - 1 - half)).all()
    assert ok, "center_rate puts the R x R positive window outside the image"


def _bce0_sum_kernel(x_ref, out_ref, *, tail_rows, needs_mask):
    """Per-tile sum of BCE-with-logits at target==0 over a (TB, HW) logits tile."""
    xf = x_ref[...].astype(jnp.float32)   # widen AFTER the load; bf16 ships as bf16
    bce0 = jnp.maximum(xf, 0.0) + jnp.log1p(jnp.exp(-jnp.abs(xf)))

    if needs_mask:
        t = pl.program_id(0)
        last = pl.num_programs(0) - 1

        @pl.when(t != last)            # hot path: full tiles, no mask
        def _():
            out_ref[...] = jnp.sum(bce0).reshape(1, 1, 1)

        @pl.when(t == last)            # cold path: only the partial tail tile
        def _():
            rows = lax.broadcasted_iota(jnp.int32, bce0.shape, 0)
            masked = jnp.where(rows < tail_rows, bce0, 0.0)
            out_ref[...] = jnp.sum(masked).reshape(1, 1, 1)
    else:
        out_ref[...] = jnp.sum(bce0).reshape(1, 1, 1)


def loss_func(cls_input, center_rate, center_R=CENTER_R):
    """Equivalent of LossFunc.forward((cls_input, None), center_rate)."""
    B, C, H, W = cls_input.shape
    assert C == 1, "PyTorch GaussianLoss masked assignment requires C == 1"
    assert center_R % 2 == 1, "this implementation covers the odd-R (`create_labels`) path"

    R = center_R
    half = R // 2
    HW = C * H * W
    dtype = cls_input.dtype
    itemsize = int(jnp.dtype(dtype).itemsize)

    ratex, ratey = center_rate
    cx = jnp.round(jnp.asarray(ratex) * (H - 1)).astype(jnp.int32).reshape(B)
    cy = jnp.round(jnp.asarray(ratey) * (W - 1)).astype(jnp.int32).reshape(B)
    _maybe_check_unclipped(cx, cy, H, W, half)

    # ---- static gaussian-window / negative-weight constants ----
    coords = np.linspace(-(R - 1) / 2.0, (R - 1) / 2.0, R)
    xx, yy = np.meshgrid(coords, coords)
    gm = np.exp(-(xx ** 2 + yy ** 2) / (2.0 * SIGMA ** 2))
    gm /= gm.sum()                                   # create_gaussian_mask normalization
    gm_j = jnp.asarray(gm, dtype=jnp.float32)        # (R, R)
    neg_num = float(B * C * H * W - B * R * R)       # un-clipped windows
    neg_w = NEG_CONST / neg_num

    # ---- batch tiling: large lane-dense (TB, HW) tiles over a parallel grid ----
    sub = {4: 8, 2: 16, 1: 32}.get(itemsize, 8)      # packed sublane granularity
    bytes_per_row = max(HW * itemsize, 1)
    rows_fit = max(sub, (_TILE_BUDGET_BYTES // bytes_per_row) // sub * sub)
    if B >= 2 * sub:
        # keep at least 2 tiles so a 2-TC chip (v7x) can split the parallel axis
        rows_fit = min(rows_fit, _round_up(pl.cdiv(B, 2), sub))
    TB = B if B <= rows_fit else rows_fit
    n_tiles = pl.cdiv(B, TB)
    tail_rows = B - (n_tiles - 1) * TB
    needs_mask = tail_rows != TB

    x2d = cls_input.reshape(B, HW)                   # lane-dense view, native dtype

    kernel = functools.partial(_bce0_sum_kernel,
                               tail_rows=int(tail_rows),
                               needs_mask=bool(needs_mask))

    tile_bytes = TB * HW * itemsize
    vmem_limit = int(min(40 << 20, max(16 << 20, 2 * tile_bytes + (2 << 20))))

    cost = pl.CostEstimate(flops=int(5 * B * HW),
                           transcendentals=int(2 * B * HW),
                           bytes_accessed=int(B * HW * itemsize + n_tiles * 4))

    partials = pl.pallas_call(
        kernel,
        out_shape=jax.ShapeDtypeStruct((n_tiles, 1, 1), jnp.float32),
        grid_spec=pltpu.PrefetchScalarGridSpec(
            num_scalar_prefetch=0,
            grid=(n_tiles,),
            in_specs=[pl.BlockSpec((TB, HW), lambda t: (t, 0))],
            out_specs=pl.BlockSpec((1, 1, 1), lambda t: (t, 0, 0))),
        compiler_params=pltpu.CompilerParams(
            dimension_semantics=("parallel",),
            vmem_limit_bytes=vmem_limit),
        cost_estimate=cost,
    )(x2d)

    S = jnp.sum(partials)            # sum of bce0 over the whole (B, 1, H, W) map

    # ---- tiny R*R*B positive-window correction in plain JAX ----
    imgs = cls_input[:, 0]                                          # (B, H, W)
    win = jax.vmap(
        lambda img, a, b: lax.dynamic_slice(img, (a - half, b - half), (R, R))
    )(imgs, cx, cy).astype(jnp.float32)                             # (B, R, R)
    bce0_w = jnp.maximum(win, 0.0) + jnp.log1p(jnp.exp(-jnp.abs(win)))
    pos_term = jnp.sum((gm_j[None] / B) * (bce0_w - win))           # w_pos * bce(target=1)
    neg_term = neg_w * (S - jnp.sum(bce0_w))                        # negatives only

    cls_loss = (neg_term + pos_term) * (1.0 / WEIGHT_SUM)           # weight.sum() == 81

    # TODO(synk): loc branch of LossFunc references undefined self.loc_loss /
    # self.loc_wight in the PyTorch source; only the loc_input=None path is valid.
    # TODO(synk): even center_R (`create_labels_2` path) not implemented.
    loc_loss = jnp.zeros((), jnp.float32)
    return cls_loss, loc_loss


def _reference_loss(cls_input, center_rate, center_R=CENTER_R):
    """Pure-JAX reference mirroring the PyTorch module (un-clipped centers)."""
    B, C, H, W = cls_input.shape
    x = cls_input.astype(jnp.float32)
    ratex, ratey = center_rate
    cx = jnp.round(jnp.asarray(ratex) * (H - 1)).astype(jnp.int32)
    cy = jnp.round(jnp.asarray(ratey) * (W - 1)).astype(jnp.int32)
    R = center_R
    half = R // 2
    coords = np.linspace(-(R - 1) / 2.0, (R - 1) / 2.0, R)
    xx, yy = np.meshgrid(coords, coords)
    gm = np.exp(-(xx ** 2 + yy ** 2) / (2.0 * SIGMA ** 2))
    gm /= gm.sum()
    gmj = jnp.asarray(gm, dtype=jnp.float32)
    ii = jnp.arange(H, dtype=jnp.int32)[None, :, None]
    jj = jnp.arange(W, dtype=jnp.int32)[None, None, :]
    dx = ii - cx[:, None, None]
    dy = jj - cy[:, None, None]
    pos = (jnp.abs(dx) <= half) & (jnp.abs(dy) <= half)        # (B, H, W)
    target = pos.astype(jnp.float32)[:, None]                  # (B, 1, H, W)
    gval = gmj[jnp.clip(dx + half, 0, R - 1), jnp.clip(dy + half, 0, R - 1)]
    neg_num = jnp.sum(1.0 - target)
    weight = jnp.where(pos[:, None], gval[:, None] / B, NEG_CONST / neg_num)
    weight = weight / weight.sum()
    bce = jnp.maximum(x, 0.0) - x * target + jnp.log1p(jnp.exp(-jnp.abs(x)))
    return jnp.sum(weight * bce)


if __name__ == "__main__":
    key = jax.random.PRNGKey(0)
    k1, k2, k3, k4 = jax.random.split(key, 4)

    # Case 1: tiny batch, single tile (block == full batch dim).
    B1, C, H, W = 2, 1, 16, 16
    x1 = jax.random.normal(k1, (B1, C, H, W), dtype=jnp.float32)
    rx1 = jnp.array([0.5, 0.3], dtype=jnp.float32)
    ry1 = jnp.array([0.4, 0.6], dtype=jnp.float32)
    cls1, loc1 = loss_func(x1, (rx1, ry1))
    jax.block_until_ready(cls1)
    jax.block_until_ready(loc1)
    ref1 = _reference_loss(x1, (rx1, ry1))
    jax.block_until_ready(ref1)
    assert jnp.allclose(cls1, ref1, rtol=1e-3, atol=1e-5), (cls1, ref1)

    # Case 2: multi-tile parallel grid with a partial (masked) tail tile.
    B2 = 20
    x2 = jax.random.normal(k2, (B2, C, H, W), dtype=jnp.float32)
    rx2 = jax.random.uniform(k3, (B2,), jnp.float32, 0.2, 0.8)
    ry2 = jax.random.uniform(k4, (B2,), jnp.float32, 0.2, 0.8)
    cls2, loc2 = loss_func(x2, (rx2, ry2))
    jax.block_until_ready(cls2)
    ref2 = _reference_loss(x2, (rx2, ry2))
    jax.block_until_ready(ref2)
    assert jnp.allclose(cls2, ref2, rtol=1e-3, atol=1e-5), (cls2, ref2)

    print("KERNEL_OK")
</pallas_src>

<mosaic_0001>
module attributes {stable_mosaic.version = 11 : i64} {
  func.func @_bce0_sum_kernel(%arg0: i32, %arg1: memref<2x256xf32, #tpu.memory_space<vmem>>, %arg2: memref<1x1x1xf32, #tpu.memory_space<vmem>>) attributes {dimension_semantics = [#tpu.dimension_semantics<parallel>], iteration_bounds = array<i64: 1>, scalar_prefetch = 0 : i64, scratch_operands = 0 : i64, tpu.core_type = #tpu.core_type<tc>, window_params = [{transform_indices = @transform_0, window_bounds = array<i64: 2, 256>}, {transform_indices = @transform_1, window_bounds = array<i64: 1, 1, 1>}]} {
    %c0 = arith.constant 0 : index
    %c0_0 = arith.constant 0 : index
    %0 = vector.load %arg1[%c0, %c0_0] : memref<2x256xf32, #tpu.memory_space<vmem>>, vector<2x256xf32>
    %cst = arith.constant 0.000000e+00 : f32
    %1 = vector.broadcast %cst : f32 to vector<2x256xf32>
    %2 = arith.maximumf %0, %1 : vector<2x256xf32>
    %3 = math.absf %0 : vector<2x256xf32>
    %cst_1 = arith.constant 0.000000e+00 : f32
    %4 = vector.broadcast %cst_1 : f32 to vector<2x256xf32>
    %5 = arith.subf %4, %3 : vector<2x256xf32>
    %6 = math.exp %5 : vector<2x256xf32>
    %7 = math.log1p %6 : vector<2x256xf32>
    %8 = arith.addf %2, %7 : vector<2x256xf32>
    %9 = vector.shape_cast %8 : vector<2x256xf32> to vector<1x2x256xf32>
    %cst_2 = arith.constant dense<0.000000e+00> : vector<1xf32>
    %10 = vector.multi_reduction <add>, %9, %cst_2 [1, 2] : vector<1x2x256xf32> to vector<1xf32>
    %11 = vector.shape_cast %10 : vector<1xf32> to vector<1x1x1xf32>
    %12 = vector.extract %11[0, 0, 0] : f32 from vector<1x1x1xf32>
    %13 = vector.broadcast %12 : f32 to vector<1x1x1xf32>
    %c0_3 = arith.constant 0 : index
    %c0_4 = arith.constant 0 : index
    %c0_5 = arith.constant 0 : index
    %14 = vector.load %arg2[%c0_3, %c0_4, %c0_5] : memref<1x1x1xf32, #tpu.memory_space<vmem>>, vector<1x1x1xf32>
    tpu.vector_store %arg2[%c0_3, %c0_4, %c0_5], %13 {strides = array<i32>} : memref<1x1x1xf32, #tpu.memory_space<vmem>>, vector<1x1x1xf32>,
    return
  }
  func.func @transform_0(%arg0: i32) -> (i32, i32) {
    %c0_i32 = arith.constant 0 : i32
    %c0_i32_0 = arith.constant 0 : i32
    return %arg0, %c0_i32 : i32, i32
  }
  func.func @transform_1(%arg0: i32) -> (i32, i32, i32) {
    %c0_i32 = arith.constant 0 : i32
    %c0_i32_0 = arith.constant 0 : i32
    %c0_i32_1 = arith.constant 0 : i32
    return %arg0, %c0_i32, %c0_i32_0 : i32, i32, i32
  }
}

</mosaic_0001>

<bundles_post_ra>
// kernel: tpu_custom_call.1
= control target key start
LH: loop header
LB: loop body
LE: loop exit
PB: predicated region body
PF: predicated region fallthrough
CT: control target
= control target key end

     0   :  { %6 = vsyncpa [#allocation3], 0  ;;  %s173_s0 = inlined_call_operand.hbm [shape: f32[2,256], index: 0, kind: input, shape index: {}]   ;;  %s174_s1 = inlined_call_operand.hbm [shape: f32[1,1,1], index: 1, kind: output, shape index: {}]  }
   0x1   :  { %7 = vsyncpa [#allocation4], 0  ;;  %s136_s6 = smov [#allocation2]   ;;  %s88_s10 = scalar_lea.hbm %s173_s0, 64 }
   0x2   :  { %s14_s7 = sshll.u32 %s136_s6, 4  ;;  %p89_p0 = scmp.ne.s32.totalorder %s173_s0, %s88_s10  ;;  %s15_s7 = int_to_ptr.vmem [resolvable:$true] %s14_s7 }
   0x3   :  { %p92_p1 = scmp.lt.u32.totalorder %s88_s10, %s173_s0 }
   0x5   :  { %p94_p2 = pnand %p92_p1, %p89_p0 }
   0x7   :  { %97 = shalt.err (!%p94_p2)
}
   0x8   :  { %s98_s15 = scalar_lea.vmem %s15_s7, 64  ;;  %p103_p4 = scmp.lt.s32.totalorder %s15_s7, %s15_s7 }
   0x9   :  { %p99_p3 = scmp.ne.s32.totalorder %s15_s7, %s98_s15  ;;  %p104_p5 = scmp.lt.s32.totalorder %s98_s15, %s98_s15 }
   0xb   :  { %p105_p6 = por %p104_p5, %p103_p4 }
   0xd   :  { %p106_p7 = pnand %p105_p6, %p99_p3 }
   0xf   :  { %109 = shalt.err (!%p106_p7)
}
  0x10   :  { %17 = dma.hbm_to_vmem [thread:$0]  %s173_s0, 64, %s15_s7, [#allocation3]  }
  0x11   :  { %132 = dma.done.wait [#allocation3], 64  }
  0x12   :  { %133 = vsyncadd [#allocation3], 4294967232  ;;  %v21_v0 = vld [vmem:[#allocation2] sm:$0xf]  ;;  %v137_v7 = vmov 1983009808   ;;  %v41_v9 = vlaneseq }
  0x13   :  { %v23_v1 = vand.u32 2147483647, %v21_v0  ;;  %v39_v8 = vunpack.c.l.s4 %v137_v7  ;;  %v22_v16 = vmax.f32 %v21_v0, 0.0  ;;  %vm48_vm1 = vcmask 1041408   ;;  %s138_s0 = smov [#allocation5]  }
  0x14   :  { %v42_v13 = vshrl.u32 %v41_v9, 7  ;;  %s70_s18 = sshll.u32 %s138_s0, 4  ;;  %vm62_vm2 = vcmask 0   ;;  %s71_s18 = int_to_ptr.vmem [resolvable:$true] %s70_s18 }
  0x15   :  { %v24_v2 = vsub.f32 0.0, %v23_v1  ;;  %v40_v12 = vunpack.c.0.s8 %v39_v8  ;;  %s110_s20 = scalar_lea.vmem %s71_s18, 16  ;;  %s114_s21 = scalar_lea.vmem %s71_s18, 32 }
  0x16   :  { %p111_p8 = scmp.ne.s32.totalorder %s71_s18, %s110_s20  ;;  %p115_p9 = scmp.lt.s32.totalorder %s71_s18, %s71_s18 }
  0x17   :  { %v25_v3 = vmul.f32 1.442695, %v24_v2  ;;  %v43_v18 = vsub.s32 %v40_v12, %v42_v13  ;;  %p116_p10 = scmp.lt.s32.totalorder %s114_s21, %s110_s20 }
  0x19   :  { %84 = vpow2.f32 %v25_v3  ;;  %p117_p11 = por %p116_p10, %p115_p9 }
  0x1b   :  { %p118_p12 = pnand %p117_p11, %p111_p8 }
  0x23   :  { %v85_v4 = vpop.eup %84 }
  0x24   :  { %v27_v5 = vadd.f32 1.0, %v85_v4  ;;  %v30_v6 = vmul.f32 -0.5, %v85_v4  ;;  %v33_v11 = vand.u32 2147483647, %v85_v4 }
  0x26   :  { %86 = vlog2.f32 %v27_v5  ;;  %v31_v10 = vadd.f32 1.0, %v30_v6  ;;  %vm34_vm0 = vcmp.lt.f32.partialorder %v33_v11, 0.0004427343 }
  0x28   :  { %v32_v14 = vmul.f32 %v85_v4, %v31_v10 }
  0x30   :  { %v87_v15 = vpop.eup %86 }
  0x31   :  { %v29_v17 = vmul.f32 0.6931472, %v87_v15 }
  0x33   :  { %v35_v19 = vsel %vm34_vm0, %v32_v14, %v29_v17 }
  0x34   :  { %v36_v20 = vadd.f32 %v35_v19, %v22_v16 }
  0x36   :  { %v44_v21 = vrot.slane %v36_v20, %v43_v18 }
  0x38   :  { %v45_v22 = vcombine.high %v44_v21, %v44_v21  ;;  %v49_v23 = vsel %vm48_vm1, %v44_v21, 0.0 }
  0x3a   :  { %v50_v24 = vsel %vm48_vm1, %v45_v22, 0.0 }
  0x3b   :  { %v51_v25 = vadd.f32 %v50_v24, %v49_v23 }
  0x3d   :  { %52 = vadd.xlane.f32.xlu0 %v51_v25 }
  0xca   :  { %v53_v26 = vpop.xlane.xlu0 %52 }
  0xcb   :  { %v54_v27 = vrot.slane %v53_v26, 4 }
  0xcd   :  { %v55_v28 = vadd.f32 %v54_v27, %v53_v26 }
  0xcf   :  { %v56_v29 = vrot.slane %v55_v28, 2 }
  0xd1   :  { %v57_v30 = vadd.f32 %v56_v29, %v55_v28 }
  0xd3   :  { %v58_v31 = vrot.slane %v57_v30, 1 }
  0xd5   :  { %v59_v32 = vadd.f32 %v58_v31, %v57_v30 }
  0xd7   :  { %79 = vpush %v59_v32 }
 0x108   :  { %s80_s19 = spop %79 }
 0x109   :  { %v61_v33 = vstv %s80_s19 }
 0x10a   :  { %63 = vst.msk [vmem:[#allocation5] sm:$0x1] %vm62_vm2, %v61_v33 }
 0x10b   :  { %121 = shalt.err (!%p118_p12)
}
 0x10c   :  { %s122_s24 = scalar_lea.hbm %s174_s1, 16 }
 0x10d   :  { %p123_p13 = scmp.ne.s32.totalorder %s174_s1, %s122_s24  ;;  %p126_p0 = scmp.lt.u32.totalorder %s122_s24, %s174_s1 }
 0x10f   :  { %p128_p1 = pnand %p126_p0, %p123_p13 }
 0x111   :  { %131 = shalt.err (!%p128_p1)
}
 0x112   :  { %73 = dma.vmem_to_hbm [thread:$0]  %s71_s18, 16, %s174_s1, [#allocation4]  }
 0x113   :  { %134 = dma.done.wait [#allocation4], 16  }
 0x114   :  { %135 = vsyncadd [#allocation4], 4294967280 }
 0x115   :  { %77 = vsyncpa [#allocation3], 1 }
 0x116   :  { %78 = vsyncpa [#allocation4], 1 }

</bundles_post_ra>
